<compile_context>
chip_gen: v7x
topology: tpu7x:2x2x1
jax: 0.10.0
libtpu: 0.0.40
codegen_flags: <defaults>
</compile_context>

<pallas_src>
import jax
import jax.numpy as jnp
from jax.experimental import pallas as pl
from jax.experimental.pallas import tpu as pltpu


def _token_confidence_kernel(b_ref, w_ref, *refs):
    """refs = (x_ref_0, ..., x_ref_{n-1}, o_ref_0, ..., o_ref_{n-1}).

    x_ref_k: (TM, D) VMEM  descriptor rows for this grid step
    o_ref_k: (1, TM) VMEM  lane-dense confidences for the same rows
    w_ref  : (1, D)  VMEM  nn.Linear(dim, 1) weight, row layout
    b_ref  : (1, 1)  SMEM  nn.Linear bias scalar
    """
    n = len(refs) // 2
    x_refs, o_refs = refs[:n], refs[n:]
    bias = b_ref[0, 0]
    for x_ref, o_ref in zip(x_refs, o_refs):
        x = x_ref[...]                                    # (TM, D)
        w = w_ref[...].astype(x.dtype)                    # (1, D)
        # (1, D) . (TM, D) contracting on D -> (1, TM): lane-major logits.
        logits = jax.lax.dot_general(
            w, x, (((1,), (1,)), ((), ())),
            preferred_element_type=jnp.float32) + bias
        o_ref[...] = jax.nn.sigmoid(logits).astype(o_ref.dtype)


def _pick_tm(m, d, itemsize, target_bytes=2 << 20):
    """Rows per tile: ~2 MiB per input buffer, multiple of 128, or all of M."""
    tm = max(1, target_bytes // max(1, d * itemsize))
    if tm >= m:
        return m                       # single full block (always legal)
    return max(128, (tm // 128) * 128)  # aligned, lane/sublane friendly


def _confidence_call(slabs, w_row, b_2d):
    """slabs: list of (M, D) arrays (same M, D, dtype). Returns list of (M,)."""
    m, d = slabs[0].shape
    dtype = slabs[0].dtype
    tm = _pick_tm(m, d, jnp.dtype(dtype).itemsize)
    g = pl.cdiv(m, tm)
    n = len(slabs)

    in_specs = [
        pl.BlockSpec(memory_space=pltpu.SMEM),            # bias (1, 1) scalar
        pl.BlockSpec((1, d), lambda i: (0, 0)),           # weight row (1, D)
    ] + [pl.BlockSpec((tm, d), lambda i: (i, 0)) for _ in range(n)]
    out_specs = tuple(pl.BlockSpec((1, tm), lambda i: (0, i)) for _ in range(n))
    out_shape = tuple(jax.ShapeDtypeStruct((1, g * tm), dtype) for _ in range(n))

    outs = pl.pallas_call(
        _token_confidence_kernel,
        out_shape=out_shape,
        grid=(g,),
        in_specs=in_specs,
        out_specs=out_specs,
        compiler_params=pltpu.CompilerParams(
            dimension_semantics=("parallel",)),
    )(b_2d, w_row, *slabs)

    if not isinstance(outs, (list, tuple)):
        outs = (outs,)
    return [o[0, :m] for o in outs]


def token_confidence(desc0, desc1, weight, bias):
    """Mirror of TokenConfidence.forward (detach is a no-op in forward).

    desc0, desc1: [..., D] descriptors (e.g. [B, N, D])
    weight:       (1, D)  nn.Linear(dim, 1) weight
    bias:         (1,)    nn.Linear(dim, 1) bias
    Returns confidences with the descriptors' leading shape (e.g. [B, N]).
    """
    d = desc0.shape[-1]
    w_row = jnp.asarray(weight).reshape(1, d)
    b_2d = jnp.asarray(bias).reshape(1, 1).astype(jnp.float32)

    d0 = desc0.reshape(-1, d)
    d1 = desc1.reshape(-1, d)

    if d0.shape == d1.shape and d0.dtype == d1.dtype:
        # Fused path: one kernel launch covers both descriptor sets.
        o0, o1 = _confidence_call([d0, d1], w_row, b_2d)
    else:
        (o0,) = _confidence_call([d0], w_row, b_2d)
        (o1,) = _confidence_call([d1], w_row, b_2d)

    return o0.reshape(desc0.shape[:-1]), o1.reshape(desc1.shape[:-1])


if __name__ == "__main__":
    key = jax.random.PRNGKey(0)
    k0, k1, kw, kb = jax.random.split(key, 4)

    B, N, D = 2, 8, 32  # small demo shapes: batch=2, tokens=8, hidden=32

    desc0 = jax.random.normal(k0, (B, N, D), dtype=jnp.float32)
    desc1 = jax.random.normal(k1, (B, N, D), dtype=jnp.float32)

    # nn.Linear(dim, 1): weight (1, dim), bias (1,). Deterministic synthetic init.
    bound = 1.0 / (D ** 0.5)
    weight = jax.random.uniform(kw, (1, D), jnp.float32, -bound, bound)
    bias = jax.random.uniform(kb, (1,), jnp.float32, -bound, bound)

    out0, out1 = jax.jit(token_confidence)(desc0, desc1, weight, bias)
    jax.block_until_ready((out0, out1))

    # Reference: plain JAX semantics of the PyTorch forward.
    ref0 = jax.nn.sigmoid(jnp.einsum("bnd,od->bno", desc0, weight) + bias)[..., 0]
    ref1 = jax.nn.sigmoid(jnp.einsum("bnd,od->bno", desc1, weight) + bias)[..., 0]

    assert out0.shape == (B, N) and out1.shape == (B, N)
    assert jnp.allclose(out0, ref0, atol=1e-4, rtol=1e-4), \
        float(jnp.max(jnp.abs(out0 - ref0)))
    assert jnp.allclose(out1, ref1, atol=1e-4, rtol=1e-4), \
        float(jnp.max(jnp.abs(out1 - ref1)))

    print("KERNEL_OK")
</pallas_src>

<mosaic_0001>
module attributes {stable_mosaic.version = 11 : i64} {
  func.func @_token_confidence_kernel(%arg0: i32, %arg1: memref<1x1xf32, #tpu.memory_space<smem>>, %arg2: memref<1x32xf32, #tpu.memory_space<vmem>>, %arg3: memref<16x32xf32, #tpu.memory_space<vmem>>, %arg4: memref<16x32xf32, #tpu.memory_space<vmem>>, %arg5: memref<1x16xf32, #tpu.memory_space<vmem>>, %arg6: memref<1x16xf32, #tpu.memory_space<vmem>>) attributes {dimension_semantics = [#tpu.dimension_semantics<parallel>], iteration_bounds = array<i64: 1>, scalar_prefetch = 0 : i64, scratch_operands = 0 : i64, tpu.core_type = #tpu.core_type<tc>, window_params = [{transform_indices = @transform_0, window_bounds = array<i64: 1, 1>}, {pipeline_mode = #tpu.pipeline_mode<synchronous>, transform_indices = @transform_1, window_bounds = array<i64: 1, 32>}, {transform_indices = @transform_2, window_bounds = array<i64: 16, 32>}, {transform_indices = @transform_3, window_bounds = array<i64: 16, 32>}, {transform_indices = @transform_4, window_bounds = array<i64: 1, 16>}, {transform_indices = @transform_5, window_bounds = array<i64: 1, 16>}]} {
    %c0 = arith.constant 0 : index
    %c0_0 = arith.constant 0 : index
    %0 = memref.load %arg1[%c0, %c0_0] : memref<1x1xf32, #tpu.memory_space<smem>>
    %c0_1 = arith.constant 0 : index
    %c0_2 = arith.constant 0 : index
    %1 = vector.load %arg3[%c0_1, %c0_2] : memref<16x32xf32, #tpu.memory_space<vmem>>, vector<16x32xf32>
    %c0_3 = arith.constant 0 : index
    %c0_4 = arith.constant 0 : index
    %2 = vector.load %arg2[%c0_3, %c0_4] : memref<1x32xf32, #tpu.memory_space<vmem>>, vector<1x32xf32>
    %cst = arith.constant dense<0.000000e+00> : vector<1x16xf32>
    %3 = tpu.matmul %2, %1, %cst {dimension_numbers = #tpu.dot_dimension_numbers<[1], [1], [0], [0], [0, 0, 1, 0], [], []>} : vector<1x32xf32>, vector<16x32xf32>, vector<1x16xf32> -> vector<1x16xf32>
    %4 = vector.broadcast %0 : f32 to vector<1x16xf32>
    %5 = arith.addf %3, %4 : vector<1x16xf32>
    %6 = arith.negf %5 : vector<1x16xf32>
    %7 = math.exp %6 : vector<1x16xf32>
    %cst_5 = arith.constant 1.000000e+00 : f32
    %8 = vector.broadcast %cst_5 : f32 to vector<1x16xf32>
    %9 = arith.addf %8, %7 : vector<1x16xf32>
    %10 = arith.divf %8, %9 : vector<1x16xf32>
    %c0_6 = arith.constant 0 : index
    %c0_7 = arith.constant 0 : index
    %11 = vector.load %arg5[%c0_6, %c0_7] : memref<1x16xf32, #tpu.memory_space<vmem>>, vector<1x16xf32>
    tpu.vector_store %arg5[%c0_6, %c0_7], %10 {strides = array<i32>} : memref<1x16xf32, #tpu.memory_space<vmem>>, vector<1x16xf32>,
    %c0_8 = arith.constant 0 : index
    %c0_9 = arith.constant 0 : index
    %12 = vector.load %arg4[%c0_8, %c0_9] : memref<16x32xf32, #tpu.memory_space<vmem>>, vector<16x32xf32>
    %c0_10 = arith.constant 0 : index
    %c0_11 = arith.constant 0 : index
    %13 = vector.load %arg2[%c0_10, %c0_11] : memref<1x32xf32, #tpu.memory_space<vmem>>, vector<1x32xf32>
    %cst_12 = arith.constant dense<0.000000e+00> : vector<1x16xf32>
    %14 = tpu.matmul %13, %12, %cst_12 {dimension_numbers = #tpu.dot_dimension_numbers<[1], [1], [0], [0], [0, 0, 1, 0], [], []>} : vector<1x32xf32>, vector<16x32xf32>, vector<1x16xf32> -> vector<1x16xf32>
    %15 = vector.broadcast %0 : f32 to vector<1x16xf32>
    %16 = arith.addf %14, %15 : vector<1x16xf32>
    %17 = arith.negf %16 : vector<1x16xf32>
    %18 = math.exp %17 : vector<1x16xf32>
    %cst_13 = arith.constant 1.000000e+00 : f32
    %19 = vector.broadcast %cst_13 : f32 to vector<1x16xf32>
    %20 = arith.addf %19, %18 : vector<1x16xf32>
    %21 = arith.divf %19, %20 : vector<1x16xf32>
    %c0_14 = arith.constant 0 : index
    %c0_15 = arith.constant 0 : index
    %22 = vector.load %arg6[%c0_14, %c0_15] : memref<1x16xf32, #tpu.memory_space<vmem>>, vector<1x16xf32>
    tpu.vector_store %arg6[%c0_14, %c0_15], %21 {strides = array<i32>} : memref<1x16xf32, #tpu.memory_space<vmem>>, vector<1x16xf32>,
    return
  }
  func.func @transform_0(%arg0: i32) -> (i32, i32) {
    %c0_i32 = arith.constant 0 : i32
    %c0_i32_0 = arith.constant 0 : i32
    %c0_i32_1 = arith.constant 0 : i32
    return %c0_i32, %c0_i32_0 : i32, i32
  }
  func.func @transform_1(%arg0: i32) -> (i32, i32) {
    %c0_i32 = arith.constant 0 : i32
    %c0_i32_0 = arith.constant 0 : i32
    %c0_i32_1 = arith.constant 0 : i32
    return %c0_i32, %c0_i32_0 : i32, i32
  }
  func.func @transform_2(%arg0: i32) -> (i32, i32) {
    %c0_i32 = arith.constant 0 : i32
    %c0_i32_0 = arith.constant 0 : i32
    return %arg0, %c0_i32 : i32, i32
  }
  func.func @transform_3(%arg0: i32) -> (i32, i32) {
    %c0_i32 = arith.constant 0 : i32
    %c0_i32_0 = arith.constant 0 : i32
    return %arg0, %c0_i32 : i32, i32
  }
  func.func @transform_4(%arg0: i32) -> (i32, i32) {
    %c0_i32 = arith.constant 0 : i32
    %c0_i32_0 = arith.constant 0 : i32
    return %c0_i32, %arg0 : i32, i32
  }
  func.func @transform_5(%arg0: i32) -> (i32, i32) {
    %c0_i32 = arith.constant 0 : i32
    %c0_i32_0 = arith.constant 0 : i32
    return %c0_i32, %arg0 : i32, i32
  }
}

</mosaic_0001>

<bundles_post_ra>
// kernel: squeeze.3
= control target key start
LH: loop header
LB: loop body
LE: loop exit
PB: predicated region body
PF: predicated region fallthrough
CT: control target
= control target key end

     0   :  { %s85_s0 = inlined_call_operand.vmem [shape: f32[16], index: 0, kind: input, shape index: {}]   ;;  %s86_s1 = inlined_call_operand.hbm [shape: f32[2,8], index: 1, kind: output, shape index: {}]  }
   0x1   :  { %v5_v0 = vld [vmem:[%s85_s0] sm:$0x1] }
   0x2   :  { %2 = vsyncpa [#allocation1], 0  ;;  %6 = vst [vmem:[#allocation3] sm:$0x1] %v5_v0  ;;  %vm8_vm0 = vcmask 64512   ;;  %s58_s0 = smov 120  }
   0x3   :  { %s59_s8 = smov [#allocation0]  }
   0x4   :  { %s26_s9 = sshll.u32 %s59_s8, 4  ;;  %s27_s9 = int_to_ptr.vmem [resolvable:$true] %s26_s9 }
   0x5   :  { %s34_s10 = scalar_lea.vmem %s27_s9, 32  ;;  %p39_p1 = scmp.lt.s32.totalorder %s27_s9, %s27_s9 }
   0x6   :  { %p35_p0 = scmp.ne.s32.totalorder %s27_s9, %s34_s10  ;;  %p40_p2 = scmp.lt.s32.totalorder %s34_s10, %s34_s10 }
   0x8   :  { %p41_p3 = por %p40_p2, %p39_p1 }
   0x9   :  { %v10_v1 = vld [vmem:[#allocation3] sm:$0x1]  }
   0xa   :  { %v7_v2 = vld [vmem:[#allocation3] sm:$0x1]   ;;  %11 = vrot.lane.b32.xlu0 %v10_v1, %s58_s0  ;;  %p42_p4 = pnand %p41_p3, %p35_p0 }
   0xb   :  { %9 = vst.msk [vmem:[#allocation2] sm:$0x1] %vm8_vm0, %v7_v2  }
  0x7c   :  { %v12_v3 = vpop.permute.xlu0 %11  }
  0x7d   :  { %15 = vst.msk [vmem:[#allocation2 + $0x1] sm:$0x1] %vm8_vm0, %v12_v3  }
  0x84   :  { %v19_v4 = vld [vmem:[#allocation2] sm:$0x3] }
  0x85   :  { %21 = vst [vmem:[#allocation0] sm:$0x3] %v19_v4 }
  0x86   :  { %45 = shalt.err (!%p42_p4)
}
  0x87   :  { %s46_s13 = scalar_lea.hbm %s86_s1, 32 }
  0x88   :  { %p47_p5 = scmp.ne.s32.totalorder %s86_s1, %s46_s13  ;;  %p50_p6 = scmp.lt.u32.totalorder %s46_s13, %s86_s1 }
  0x8a   :  { %p52_p7 = pnand %p50_p6, %p47_p5 }
  0x8c   :  { %55 = shalt.err (!%p52_p7)
}
  0x8d   :  { %29 = dma.vmem_to_hbm [thread:$0]  %s27_s9, 32, %s86_s1, [#allocation1]  }
  0x8e   :  { %56 = dma.done.wait [#allocation1], 32  }
  0x8f   :  { %57 = vsyncadd [#allocation1], 4294967264 }
  0x90   :  { %31 = vsyncpa [#allocation1], 1 }

// kernel: token_confidence.1
= control target key start
LH: loop header
LB: loop body
LE: loop exit
PB: predicated region body
PF: predicated region fallthrough
CT: control target
= control target key end

     0   :  { %12 = vsyncpa [#allocation4], 0  ;;  %s299_s18 = smov [#allocation3]   ;;  %s368_s0 = inlined_call_operand.<no memory space> [shape: f32[1,1], index: 0, kind: input, shape index: {}]   ;;  %s369_s1 = inlined_call_operand.vmem [shape: f32[1,32], index: 1, kind: input, shape index: {}]   ;;  %s370_s2 = inlined_call_operand.hbm [shape: f32[16,32], index: 2, kind: input, shape index: {}]   ;;  %s371_s3 = inlined_call_operand.vmem [shape: f32[16,32], index: 3, kind: input, shape index: {}]   ;;  %s372_s4 = inlined_call_operand.vmem [shape: f32[1,16], index: 4, kind: output, shape index: {0}]   ;;  %s373_s5 = inlined_call_operand.vmem [shape: f32[1,16], index: 5, kind: output, shape index: {1}]  }
   0x1   :  { %s22_s19 = sshll.u32 %s299_s18, 4  ;;  %s275_s22 = scalar_lea.hbm %s370_s2, 256  ;;  %s23_s19 = int_to_ptr.vmem [resolvable:$true] %s22_s19 }
   0x2   :  { %p276_p0 = scmp.ne.s32.totalorder %s370_s2, %s275_s22  ;;  %p279_p1 = scmp.lt.u32.totalorder %s275_s22, %s370_s2 }
   0x4   :  { %p281_p2 = pnand %p279_p1, %p276_p0 }
   0x6   :  { %284 = shalt.err (!%p281_p2)
}
   0x7   :  { %s285_s27 = scalar_lea.vmem %s23_s19, 256  ;;  %p290_p4 = scmp.lt.s32.totalorder %s23_s19, %s23_s19 }
   0x8   :  { %p286_p3 = scmp.ne.s32.totalorder %s23_s19, %s285_s27  ;;  %p291_p5 = scmp.lt.s32.totalorder %s285_s27, %s285_s27 }
   0xa   :  { %p292_p6 = por %p291_p5, %p290_p4 }
   0xc   :  { %p293_p7 = pnand %p292_p6, %p286_p3 }
   0xe   :  { %296 = shalt.err (!%p293_p7)
}
   0xf   :  { %s300_s28 = smov 128   ;;  %s301_s29 = smov 8  }
  0x10   :  { %28 = dma.hbm_to_vmem [thread:$0]  %s370_s2, 256, %s23_s19, [#allocation4], %s300_s28, %s300_s28, %s301_s29  }
  0x11   :  { %297 = dma.done.wait [#allocation4], 256  }
  0x12   :  { %298 = vsyncadd [#allocation4], 4294967040  ;;  %v302_v0 = vmov 0.0|0.0   ;;  %vm303_vm0 = vmmov 0   ;;  %v304_v1 = vmov 0.0   ;;  %vm39_vm1 = vcmask 261120  }
  0x13   :  { %253 = vmatprep.subr.bf16.mxu0 %v302_v0  ;;  %257 = vmatprep.subr.bf16.mxu1 %v302_v0  ;;  %vm255_vm2 = vmpackc.low %vm39_vm1, %vm39_vm1  ;;  %v35_v2 = vld [vmem:[#allocation3] sm:$0xff]  ;;  %v36_v3 = vld [vmem:[#allocation3 + $0x8] sm:$0xff]  ;;  %v38_v10 = vstv %s368_s0  ;;  %vm125_vm3 = vcmask 122880  }
  0x14   :  { %243 = vmatprep.mubr.msk.f32.mxu0 %vm303_vm0, %v304_v1  ;;  %250 = vmatprep.mubr.msk.f32.mxu1 %vm303_vm0, %v304_v1  ;;  %v127_v4 = vld [vmem:[%s371_s3] sm:$0xff]  ;;  %v254_v5 = vpack.c.bf16 %v36_v3, %v35_v2  ;;  %v128_v6 = vld [vmem:[%s371_s3 + $0x8] sm:$0xff] }
  0x15   :  { %v258_v7 = vpack.c.bf16 %v128_v6, %v127_v4  ;;  %v37_v8 = vld [vmem:[%s369_s1] sm:$0x1] }
  0x16   :  { %256 = vmatpush3.bf16.xpose.msk.msra.mxu0 %vm255_vm2, %v254_v5  ;;  %v129_v9 = vld [vmem:[%s369_s1] sm:$0x1] }
  0x17   :  { %260 = vmatpush3.bf16.xpose.msk.msra.mxu1 %vm255_vm2, %v258_v7 }
  0x1d   :  { %244 = vmatmul.mubr.msk.f32.vlgmr.msra.gmra.mrb[0].mxu0 %vm39_vm1, %v37_v8 }
  0x1e   :  { %251 = vmatmul.mubr.msk.f32.vlgmr.msra.gmra.mrb[0].mxu1 %vm39_vm1, %v129_v9 }
  0xf0   :  { %v115_v11 = vpop.f32.mrb[0].mxu0 }
  0xf1   :  { %v116_v12 = vadd.f32 %v115_v11, %v38_v10  ;;  %v205_v13 = vpop.f32.mrb[0].mxu1  ;;  %v245_v14 = vpop.f32.mrb[1].mxu0 }
  0xf2   :  { %v206_v15 = vadd.f32 %v205_v13, %v38_v10  ;;  %v252_v16 = vpop.f32.mrb[1].mxu1 }
  0xf3   :  { %v228_v17 = vmul.f32 -1.442695, %v116_v12 }
  0xf4   :  { %v232_v18 = vmul.f32 -1.442695, %v206_v15 }
  0xf5   :  { %267 = vpow2.f32 %v228_v17 }
  0xf6   :  { %269 = vpow2.f32 %v232_v18 }
  0xff   :  { %v268_v19 = vpop.eup %267 }
 0x100   :  { %v270_v20 = vpop.eup %269  ;;  %v122_v21 = vadd.f32 1.0, %v268_v19 }
 0x101   :  { %v212_v22 = vadd.f32 1.0, %v270_v20 }
 0x102   :  { %271 = vrcp.f32 %v122_v21 }
 0x103   :  { %273 = vrcp.f32 %v212_v22 }
 0x10c   :  { %v272_v23 = vpop.eup %271 }
 0x10d   :  { %v274_v24 = vpop.eup %273  ;;  %126 = vst.msk [vmem:[%s372_s4] sm:$0x1] %vm125_vm3, %v272_v23 }
 0x10e   :  { %215 = vst.msk [vmem:[%s373_s5] sm:$0x1] %vm125_vm3, %v274_v24 }
 0x10f   :  { %224 = vsyncpa [#allocation4], 1 }

</bundles_post_ra>
